<compile_context>
chip_gen: v5e
topology: v5e:2x2
jax: 0.10.0
libtpu: 0.0.40
codegen_flags: <defaults>
</compile_context>

<pallas_src>
import functools

import jax
import jax.numpy as jnp
from jax import lax
from jax.experimental import pallas as pl
from jax.experimental.pallas import tpu as pltpu


def _cnn_block_kernel(planes_ref, w_ref, b_ref, o_ref, *, ww1):
    """Fused 3x3 conv (pad=1) + 2x2/2 max-pool + ReLU for one batch element.

    planes_ref: (1, 4, Cin, Pplane) bf16 — padded input split into the four
                (row-parity, col-parity) planes, each flattened in (row, col)
                order with row pitch ww1 = ww + 1 (plus a zero tail).
    w_ref:      (9, Cout, Cin) bf16 — conv weights, tap-major (t = 3*ky + kx).
    b_ref:      (Cout, 1) f32 — conv bias (lane-broadcast column vector).
    o_ref:      (1, Cout, L) — pooled + ReLU output on the flattened plane
                grid; the valid pooled pixel (p, q) lives at lane p*ww1 + q.
    """
    lanes = o_ref.shape[-1]
    planes = [planes_ref[0, i] for i in range(4)]         # 4 x (Cin, Pplane) bf16
    w_taps = [w_ref[t] for t in range(9)]                 # 9 x (Cout, Cin)   bf16

    pooled = None
    for a in range(2):                                    # pool-window row phase
        for b in range(2):                                # pool-window col phase
            acc = None                                    # conv at (2p+a, 2q+b)
            for ky in range(3):
                for kx in range(3):
                    r, c = a + ky, b + kx                 # offsets in padded image
                    pi = 2 * (r & 1) + (c & 1)            # parity plane for this tap
                    s = (r >> 1) * ww1 + (c >> 1)         # static lane shift in plane
                    rhs = planes[pi][:, s:s + lanes]      # (Cin, L) shifted tap view
                    contrib = jnp.dot(w_taps[3 * ky + kx], rhs,
                                      preferred_element_type=jnp.float32)
                    acc = contrib if acc is None else acc + contrib
            # 2x2 max-pool == running max over the 4 phases (keeps the live f32
            # state to one accumulator + one running max, per review).
            pooled = acc if pooled is None else jnp.maximum(pooled, acc)

    # Per-channel bias commutes with the max; ReLU last.
    o_ref[0] = jnp.maximum(pooled + b_ref[...], 0.0).astype(o_ref.dtype)


def _vmem_limit_bytes() -> int:
    """Generation-aware scoped-VMEM request (v7x: 64 MiB/TC, v5e/v6e: 128 MiB)."""
    cap = 64 * 1024 * 1024                                # conservative default (v7x)
    try:
        cap = int(pltpu.get_tpu_info().vmem_capacity_bytes)
    except Exception:
        pass
    return min(cap * 3 // 4, 100 * 1024 * 1024)


def cnn_block(x_nchw, weight_oihw, bias, out_dtype=None):
    """Forward pass of CNNBlock.  Input/output are NCHW, like PyTorch."""
    n, cin, h, w = x_nchw.shape
    cout, cin_w, kh, kw = weight_oihw.shape
    assert (cin_w, kh, kw) == (cin, 3, 3), "expected a 3x3 conv with matching Cin"
    # PyTorch MaxPool2d(2,2) floors odd spatial dims; only the even case is supported.
    assert h % 2 == 0 and w % 2 == 0, "spatial dims must be even for the 2x2/2 pool"
    out_dtype = jnp.dtype(x_nchw.dtype if out_dtype is None else out_dtype)

    hh, ww = h // 2, w // 2
    ww1 = ww + 1                                    # flat row pitch inside a parity plane
    p_valid = (hh + 1) * ww1                        # flat size of one parity plane
    lanes = pl.cdiv(p_valid, 128) * 128             # output lane width (unmasked vst)
    p_plane = lanes + pl.cdiv(ww1 + 1, 128) * 128   # plane width incl. max tap shift room

    # ---- layout glue (one cheap XLA pass, ~input-sized): pad + parity split ----
    # plane[pr, pc][c, u, v] = xpad[c, 2u + pr, 2v + pc], flattened to u*ww1 + v.
    xp = jnp.pad(x_nchw, ((0, 0), (0, 0), (1, 1), (1, 1)))          # (N, Cin, H+2, W+2)
    xr = xp.reshape(n, cin, hh + 1, 2, ww1, 2)
    planes = jnp.transpose(xr, (0, 3, 5, 1, 2, 4)).reshape(n, 4, cin, p_valid)
    planes = jnp.pad(planes, ((0, 0), (0, 0), (0, 0), (0, p_plane - p_valid)))
    planes = planes.astype(jnp.bfloat16)                             # (N, 4, Cin, Pplane)

    w9 = jnp.transpose(weight_oihw, (2, 3, 0, 1)).reshape(9, cout, cin)
    w9 = w9.astype(jnp.bfloat16)                                     # tap-major weights
    b2 = bias.reshape(cout, 1).astype(jnp.float32)

    # ---- explicit VMEM budget: double-buffered blocks + live f32 intermediates ----
    vmem_limit = _vmem_limit_bytes()
    est = (2 * (4 * cin * p_plane * 2                 # planes block (bf16, double-buffered)
                + 9 * cout * cin * 2                  # weight block
                + cout * 4                            # bias block
                + cout * lanes * out_dtype.itemsize)  # output block
           + 2 * cout * lanes * 4                     # f32 phase accumulator + running max
           + cin * lanes * 2)                         # one shifted tap view
    # TODO(synk): strip-tile the pixel axis (halo = one plane row) if this trips.
    assert est <= vmem_limit, (est, vmem_limit)

    out_flat = pl.pallas_call(
        functools.partial(_cnn_block_kernel, ww1=ww1),
        out_shape=jax.ShapeDtypeStruct((n, cout, lanes), out_dtype),
        grid=(n,),
        in_specs=[
            pl.BlockSpec((1, 4, cin, p_plane), lambda i: (i, 0, 0, 0)),
            pl.BlockSpec((9, cout, cin), lambda i: (0, 0, 0)),
            pl.BlockSpec((cout, 1), lambda i: (0, 0)),
        ],
        out_specs=pl.BlockSpec((1, cout, lanes), lambda i: (i, 0, 0)),
        compiler_params=pltpu.CompilerParams(
            dimension_semantics=("parallel",),
            vmem_limit_bytes=vmem_limit,
        ),
    )(planes, w9, b2)

    # De-pad: pooled pixel (p, q) lives at lane p*ww1 + q.  The output is
    # already in (N, Cout, pixels) order, so this is a small slice + reshape —
    # no NCHW transpose pass.
    out = out_flat[:, :, :p_valid].reshape(n, cout, hh + 1, ww1)
    return out[:, :, :hh, :ww]


def _reference(x_nchw, weight_oihw, bias):
    """Pure-JAX reference matching nn.Conv2d(3, pad=1) -> MaxPool2d(2,2) -> ReLU."""
    conv = lax.conv_general_dilated(
        x_nchw, weight_oihw, window_strides=(1, 1), padding=((1, 1), (1, 1)),
        dimension_numbers=("NCHW", "OIHW", "NCHW"),
    ) + bias[None, :, None, None]
    pooled = lax.reduce_window(
        conv, -jnp.inf, lax.max,
        window_dimensions=(1, 1, 2, 2), window_strides=(1, 1, 2, 2),
        padding="VALID",
    )
    return jnp.maximum(pooled, 0.0)


if __name__ == "__main__":
    N, CIN, COUT, H, W = 2, 4, 8, 16, 16

    key = jax.random.PRNGKey(0)
    k_x, k_w, k_b = jax.random.split(key, 3)

    x = jax.random.normal(k_x, (N, CIN, H, W), dtype=jnp.float32)
    # "PyTorch-shaped" parameters: weight (Cout, Cin, 3, 3), bias (Cout,)
    weight = 0.1 * jax.random.normal(k_w, (COUT, CIN, 3, 3), dtype=jnp.float32)
    bias = 0.1 * jax.random.normal(k_b, (COUT,), dtype=jnp.float32)

    out = jax.block_until_ready(jax.jit(cnn_block)(x, weight, bias))
    ref = jax.block_until_ready(_reference(x, weight, bias))

    assert out.shape == (N, COUT, H // 2, W // 2), out.shape
    # bf16 matmul operands (f32 accumulation) -> loosened tolerance vs f32 reference
    assert jnp.allclose(out, ref, atol=3e-2, rtol=3e-2), float(jnp.max(jnp.abs(out - ref)))

    print("KERNEL_OK")
</pallas_src>

<mosaic_0001>
module attributes {stable_mosaic.version = 11 : i64} {
  func.func @_cnn_block_kernel(%arg0: i32, %arg1: memref<1x4x4x256xbf16, #tpu.memory_space<vmem>>, %arg2: memref<9x8x4xbf16, #tpu.memory_space<vmem>>, %arg3: memref<8x1xf32, #tpu.memory_space<vmem>>, %arg4: memref<1x8x128xf32, #tpu.memory_space<vmem>>) attributes {dimension_semantics = [#tpu.dimension_semantics<parallel>], iteration_bounds = array<i64: 2>, scalar_prefetch = 0 : i64, scratch_operands = 0 : i64, tpu.core_type = #tpu.core_type<tc>, window_params = [{transform_indices = @transform_0, window_bounds = array<i64: 1, 4, 4, 256>}, {pipeline_mode = #tpu.pipeline_mode<synchronous>, transform_indices = @transform_1, window_bounds = array<i64: 9, 8, 4>}, {pipeline_mode = #tpu.pipeline_mode<synchronous>, transform_indices = @transform_2, window_bounds = array<i64: 8, 1>}, {transform_indices = @transform_3, window_bounds = array<i64: 1, 8, 128>}]} {
    %c0 = arith.constant 0 : index
    %c0_0 = arith.constant 0 : index
    %c0_1 = arith.constant 0 : index
    %c0_2 = arith.constant 0 : index
    %0 = vector.load %arg1[%c0, %c0_0, %c0_1, %c0_2] : memref<1x4x4x256xbf16, #tpu.memory_space<vmem>>, vector<1x1x4x256xbf16>
    %1 = vector.shape_cast %0 : vector<1x1x4x256xbf16> to vector<4x256xbf16>
    %c0_3 = arith.constant 0 : index
    %c1 = arith.constant 1 : index
    %c0_4 = arith.constant 0 : index
    %c0_5 = arith.constant 0 : index
    %2 = vector.load %arg1[%c0_3, %c1, %c0_4, %c0_5] : memref<1x4x4x256xbf16, #tpu.memory_space<vmem>>, vector<1x1x4x256xbf16>
    %3 = vector.shape_cast %2 : vector<1x1x4x256xbf16> to vector<4x256xbf16>
    %c0_6 = arith.constant 0 : index
    %c2 = arith.constant 2 : index
    %c0_7 = arith.constant 0 : index
    %c0_8 = arith.constant 0 : index
    %4 = vector.load %arg1[%c0_6, %c2, %c0_7, %c0_8] : memref<1x4x4x256xbf16, #tpu.memory_space<vmem>>, vector<1x1x4x256xbf16>
    %5 = vector.shape_cast %4 : vector<1x1x4x256xbf16> to vector<4x256xbf16>
    %c0_9 = arith.constant 0 : index
    %c3 = arith.constant 3 : index
    %c0_10 = arith.constant 0 : index
    %c0_11 = arith.constant 0 : index
    %6 = vector.load %arg1[%c0_9, %c3, %c0_10, %c0_11] : memref<1x4x4x256xbf16, #tpu.memory_space<vmem>>, vector<1x1x4x256xbf16>
    %7 = vector.shape_cast %6 : vector<1x1x4x256xbf16> to vector<4x256xbf16>
    %c0_12 = arith.constant 0 : index
    %c0_13 = arith.constant 0 : index
    %c0_14 = arith.constant 0 : index
    %8 = vector.load %arg2[%c0_12, %c0_13, %c0_14] : memref<9x8x4xbf16, #tpu.memory_space<vmem>>, vector<1x8x4xbf16>
    %9 = vector.shape_cast %8 : vector<1x8x4xbf16> to vector<8x4xbf16>
    %c1_15 = arith.constant 1 : index
    %c0_16 = arith.constant 0 : index
    %c0_17 = arith.constant 0 : index
    %10 = vector.load %arg2[%c1_15, %c0_16, %c0_17] : memref<9x8x4xbf16, #tpu.memory_space<vmem>>, vector<1x8x4xbf16>
    %11 = vector.shape_cast %10 : vector<1x8x4xbf16> to vector<8x4xbf16>
    %c2_18 = arith.constant 2 : index
    %c0_19 = arith.constant 0 : index
    %c0_20 = arith.constant 0 : index
    %12 = vector.load %arg2[%c2_18, %c0_19, %c0_20] : memref<9x8x4xbf16, #tpu.memory_space<vmem>>, vector<1x8x4xbf16>
    %13 = vector.shape_cast %12 : vector<1x8x4xbf16> to vector<8x4xbf16>
    %c3_21 = arith.constant 3 : index
    %c0_22 = arith.constant 0 : index
    %c0_23 = arith.constant 0 : index
    %14 = vector.load %arg2[%c3_21, %c0_22, %c0_23] : memref<9x8x4xbf16, #tpu.memory_space<vmem>>, vector<1x8x4xbf16>
    %15 = vector.shape_cast %14 : vector<1x8x4xbf16> to vector<8x4xbf16>
    %c4 = arith.constant 4 : index
    %c0_24 = arith.constant 0 : index
    %c0_25 = arith.constant 0 : index
    %16 = vector.load %arg2[%c4, %c0_24, %c0_25] : memref<9x8x4xbf16, #tpu.memory_space<vmem>>, vector<1x8x4xbf16>
    %17 = vector.shape_cast %16 : vector<1x8x4xbf16> to vector<8x4xbf16>
    %c5 = arith.constant 5 : index
    %c0_26 = arith.constant 0 : index
    %c0_27 = arith.constant 0 : index
    %18 = vector.load %arg2[%c5, %c0_26, %c0_27] : memref<9x8x4xbf16, #tpu.memory_space<vmem>>, vector<1x8x4xbf16>
    %19 = vector.shape_cast %18 : vector<1x8x4xbf16> to vector<8x4xbf16>
    %c6 = arith.constant 6 : index
    %c0_28 = arith.constant 0 : index
    %c0_29 = arith.constant 0 : index
    %20 = vector.load %arg2[%c6, %c0_28, %c0_29] : memref<9x8x4xbf16, #tpu.memory_space<vmem>>, vector<1x8x4xbf16>
    %21 = vector.shape_cast %20 : vector<1x8x4xbf16> to vector<8x4xbf16>
    %c7 = arith.constant 7 : index
    %c0_30 = arith.constant 0 : index
    %c0_31 = arith.constant 0 : index
    %22 = vector.load %arg2[%c7, %c0_30, %c0_31] : memref<9x8x4xbf16, #tpu.memory_space<vmem>>, vector<1x8x4xbf16>
    %23 = vector.shape_cast %22 : vector<1x8x4xbf16> to vector<8x4xbf16>
    %c8 = arith.constant 8 : index
    %c0_32 = arith.constant 0 : index
    %c0_33 = arith.constant 0 : index
    %24 = vector.load %arg2[%c8, %c0_32, %c0_33] : memref<9x8x4xbf16, #tpu.memory_space<vmem>>, vector<1x8x4xbf16>
    %25 = vector.shape_cast %24 : vector<1x8x4xbf16> to vector<8x4xbf16>
    %26 = vector.extract_strided_slice %1 {offsets = [0, 0], sizes = [4, 128], strides = [1, 1]} : vector<4x256xbf16> to vector<4x128xbf16>
    %cst = arith.constant dense<0.000000e+00> : vector<8x128xf32>
    %27 = tpu.matmul %9, %26, %cst {dimension_numbers = #tpu.dot_dimension_numbers<[1], [0], [0], [1], [0, 0, 1, 1], [], []>} : vector<8x4xbf16>, vector<4x128xbf16>, vector<8x128xf32> -> vector<8x128xf32>
    %28 = vector.extract_strided_slice %3 {offsets = [0, 0], sizes = [4, 128], strides = [1, 1]} : vector<4x256xbf16> to vector<4x128xbf16>
    %cst_34 = arith.constant dense<0.000000e+00> : vector<8x128xf32>
    %29 = tpu.matmul %11, %28, %cst_34 {dimension_numbers = #tpu.dot_dimension_numbers<[1], [0], [0], [1], [0, 0, 1, 1], [], []>} : vector<8x4xbf16>, vector<4x128xbf16>, vector<8x128xf32> -> vector<8x128xf32>
    %30 = arith.addf %27, %29 : vector<8x128xf32>
    %31 = vector.extract_strided_slice %1 {offsets = [0, 1], sizes = [4, 128], strides = [1, 1]} : vector<4x256xbf16> to vector<4x128xbf16>
    %cst_35 = arith.constant dense<0.000000e+00> : vector<8x128xf32>
    %32 = tpu.matmul %13, %31, %cst_35 {dimension_numbers = #tpu.dot_dimension_numbers<[1], [0], [0], [1], [0, 0, 1, 1], [], []>} : vector<8x4xbf16>, vector<4x128xbf16>, vector<8x128xf32> -> vector<8x128xf32>
    %33 = arith.addf %30, %32 : vector<8x128xf32>
    %34 = vector.extract_strided_slice %5 {offsets = [0, 0], sizes = [4, 128], strides = [1, 1]} : vector<4x256xbf16> to vector<4x128xbf16>
    %cst_36 = arith.constant dense<0.000000e+00> : vector<8x128xf32>
    %35 = tpu.matmul %15, %34, %cst_36 {dimension_numbers = #tpu.dot_dimension_numbers<[1], [0], [0], [1], [0, 0, 1, 1], [], []>} : vector<8x4xbf16>, vector<4x128xbf16>, vector<8x128xf32> -> vector<8x128xf32>
    %36 = arith.addf %33, %35 : vector<8x128xf32>
    %37 = vector.extract_strided_slice %7 {offsets = [0, 0], sizes = [4, 128], strides = [1, 1]} : vector<4x256xbf16> to vector<4x128xbf16>
    %cst_37 = arith.constant dense<0.000000e+00> : vector<8x128xf32>
    %38 = tpu.matmul %17, %37, %cst_37 {dimension_numbers = #tpu.dot_dimension_numbers<[1], [0], [0], [1], [0, 0, 1, 1], [], []>} : vector<8x4xbf16>, vector<4x128xbf16>, vector<8x128xf32> -> vector<8x128xf32>
    %39 = arith.addf %36, %38 : vector<8x128xf32>
    %40 = vector.extract_strided_slice %5 {offsets = [0, 1], sizes = [4, 128], strides = [1, 1]} : vector<4x256xbf16> to vector<4x128xbf16>
    %cst_38 = arith.constant dense<0.000000e+00> : vector<8x128xf32>
    %41 = tpu.matmul %19, %40, %cst_38 {dimension_numbers = #tpu.dot_dimension_numbers<[1], [0], [0], [1], [0, 0, 1, 1], [], []>} : vector<8x4xbf16>, vector<4x128xbf16>, vector<8x128xf32> -> vector<8x128xf32>
    %42 = arith.addf %39, %41 : vector<8x128xf32>
    %43 = vector.extract_strided_slice %1 {offsets = [0, 9], sizes = [4, 128], strides = [1, 1]} : vector<4x256xbf16> to vector<4x128xbf16>
    %cst_39 = arith.constant dense<0.000000e+00> : vector<8x128xf32>
    %44 = tpu.matmul %21, %43, %cst_39 {dimension_numbers = #tpu.dot_dimension_numbers<[1], [0], [0], [1], [0, 0, 1, 1], [], []>} : vector<8x4xbf16>, vector<4x128xbf16>, vector<8x128xf32> -> vector<8x128xf32>
    %45 = arith.addf %42, %44 : vector<8x128xf32>
    %46 = vector.extract_strided_slice %3 {offsets = [0, 9], sizes = [4, 128], strides = [1, 1]} : vector<4x256xbf16> to vector<4x128xbf16>
    %cst_40 = arith.constant dense<0.000000e+00> : vector<8x128xf32>
    %47 = tpu.matmul %23, %46, %cst_40 {dimension_numbers = #tpu.dot_dimension_numbers<[1], [0], [0], [1], [0, 0, 1, 1], [], []>} : vector<8x4xbf16>, vector<4x128xbf16>, vector<8x128xf32> -> vector<8x128xf32>
    %48 = arith.addf %45, %47 : vector<8x128xf32>
    %49 = vector.extract_strided_slice %1 {offsets = [0, 10], sizes = [4, 128], strides = [1, 1]} : vector<4x256xbf16> to vector<4x128xbf16>
    %cst_41 = arith.constant dense<0.000000e+00> : vector<8x128xf32>
    %50 = tpu.matmul %25, %49, %cst_41 {dimension_numbers = #tpu.dot_dimension_numbers<[1], [0], [0], [1], [0, 0, 1, 1], [], []>} : vector<8x4xbf16>, vector<4x128xbf16>, vector<8x128xf32> -> vector<8x128xf32>
    %51 = arith.addf %48, %50 : vector<8x128xf32>
    %52 = vector.extract_strided_slice %3 {offsets = [0, 0], sizes = [4, 128], strides = [1, 1]} : vector<4x256xbf16> to vector<4x128xbf16>
    %cst_42 = arith.constant dense<0.000000e+00> : vector<8x128xf32>
    %53 = tpu.matmul %9, %52, %cst_42 {dimension_numbers = #tpu.dot_dimension_numbers<[1], [0], [0], [1], [0, 0, 1, 1], [], []>} : vector<8x4xbf16>, vector<4x128xbf16>, vector<8x128xf32> -> vector<8x128xf32>
    %54 = vector.extract_strided_slice %1 {offsets = [0, 1], sizes = [4, 128], strides = [1, 1]} : vector<4x256xbf16> to vector<4x128xbf16>
    %cst_43 = arith.constant dense<0.000000e+00> : vector<8x128xf32>
    %55 = tpu.matmul %11, %54, %cst_43 {dimension_numbers = #tpu.dot_dimension_numbers<[1], [0], [0], [1], [0, 0, 1, 1], [], []>} : vector<8x4xbf16>, vector<4x128xbf16>, vector<8x128xf32> -> vector<8x128xf32>
    %56 = arith.addf %53, %55 : vector<8x128xf32>
    %57 = vector.extract_strided_slice %3 {offsets = [0, 1], sizes = [4, 128], strides = [1, 1]} : vector<4x256xbf16> to vector<4x128xbf16>
    %cst_44 = arith.constant dense<0.000000e+00> : vector<8x128xf32>
    %58 = tpu.matmul %13, %57, %cst_44 {dimension_numbers = #tpu.dot_dimension_numbers<[1], [0], [0], [1], [0, 0, 1, 1], [], []>} : vector<8x4xbf16>, vector<4x128xbf16>, vector<8x128xf32> -> vector<8x128xf32>
    %59 = arith.addf %56, %58 : vector<8x128xf32>
    %60 = vector.extract_strided_slice %7 {offsets = [0, 0], sizes = [4, 128], strides = [1, 1]} : vector<4x256xbf16> to vector<4x128xbf16>
    %cst_45 = arith.constant dense<0.000000e+00> : vector<8x128xf32>
    %61 = tpu.matmul %15, %60, %cst_45 {dimension_numbers = #tpu.dot_dimension_numbers<[1], [0], [0], [1], [0, 0, 1, 1], [], []>} : vector<8x4xbf16>, vector<4x128xbf16>, vector<8x128xf32> -> vector<8x128xf32>
    %62 = arith.addf %59, %61 : vector<8x128xf32>
    %63 = vector.extract_strided_slice %5 {offsets = [0, 1], sizes = [4, 128], strides = [1, 1]} : vector<4x256xbf16> to vector<4x128xbf16>
    %cst_46 = arith.constant dense<0.000000e+00> : vector<8x128xf32>
    %64 = tpu.matmul %17, %63, %cst_46 {dimension_numbers = #tpu.dot_dimension_numbers<[1], [0], [0], [1], [0, 0, 1, 1], [], []>} : vector<8x4xbf16>, vector<4x128xbf16>, vector<8x128xf32> -> vector<8x128xf32>
    %65 = arith.addf %62, %64 : vector<8x128xf32>
    %66 = vector.extract_strided_slice %7 {offsets = [0, 1], sizes = [4, 128], strides = [1, 1]} : vector<4x256xbf16> to vector<4x128xbf16>
    %cst_47 = arith.constant dense<0.000000e+00> : vector<8x128xf32>
    %67 = tpu.matmul %19, %66, %cst_47 {dimension_numbers = #tpu.dot_dimension_numbers<[1], [0], [0], [1], [0, 0, 1, 1], [], []>} : vector<8x4xbf16>, vector<4x128xbf16>, vector<8x128xf32> -> vector<8x128xf32>
    %68 = arith.addf %65, %67 : vector<8x128xf32>
    %69 = vector.extract_strided_slice %3 {offsets = [0, 9], sizes = [4, 128], strides = [1, 1]} : vector<4x256xbf16> to vector<4x128xbf16>
    %cst_48 = arith.constant dense<0.000000e+00> : vector<8x128xf32>
    %70 = tpu.matmul %21, %69, %cst_48 {dimension_numbers = #tpu.dot_dimension_numbers<[1], [0], [0], [1], [0, 0, 1, 1], [], []>} : vector<8x4xbf16>, vector<4x128xbf16>, vector<8x128xf32> -> vector<8x128xf32>
    %71 = arith.addf %68, %70 : vector<8x128xf32>
    %72 = vector.extract_strided_slice %1 {offsets = [0, 10], sizes = [4, 128], strides = [1, 1]} : vector<4x256xbf16> to vector<4x128xbf16>
    %cst_49 = arith.constant dense<0.000000e+00> : vector<8x128xf32>
    %73 = tpu.matmul %23, %72, %cst_49 {dimension_numbers = #tpu.dot_dimension_numbers<[1], [0], [0], [1], [0, 0, 1, 1], [], []>} : vector<8x4xbf16>, vector<4x128xbf16>, vector<8x128xf32> -> vector<8x128xf32>
    %74 = arith.addf %71, %73 : vector<8x128xf32>
    %75 = vector.extract_strided_slice %3 {offsets = [0, 10], sizes = [4, 128], strides = [1, 1]} : vector<4x256xbf16> to vector<4x128xbf16>
    %cst_50 = arith.constant dense<0.000000e+00> : vector<8x128xf32>
    %76 = tpu.matmul %25, %75, %cst_50 {dimension_numbers = #tpu.dot_dimension_numbers<[1], [0], [0], [1], [0, 0, 1, 1], [], []>} : vector<8x4xbf16>, vector<4x128xbf16>, vector<8x128xf32> -> vector<8x128xf32>
    %77 = arith.addf %74, %76 : vector<8x128xf32>
    %78 = arith.maximumf %51, %77 : vector<8x128xf32>
    %79 = vector.extract_strided_slice %5 {offsets = [0, 0], sizes = [4, 128], strides = [1, 1]} : vector<4x256xbf16> to vector<4x128xbf16>
    %cst_51 = arith.constant dense<0.000000e+00> : vector<8x128xf32>
    %80 = tpu.matmul %9, %79, %cst_51 {dimension_numbers = #tpu.dot_dimension_numbers<[1], [0], [0], [1], [0, 0, 1, 1], [], []>} : vector<8x4xbf16>, vector<4x128xbf16>, vector<8x128xf32> -> vector<8x128xf32>
    %81 = vector.extract_strided_slice %7 {offsets = [0, 0], sizes = [4, 128], strides = [1, 1]} : vector<4x256xbf16> to vector<4x128xbf16>
    %cst_52 = arith.constant dense<0.000000e+00> : vector<8x128xf32>
    %82 = tpu.matmul %11, %81, %cst_52 {dimension_numbers = #tpu.dot_dimension_numbers<[1], [0], [0], [1], [0, 0, 1, 1], [], []>} : vector<8x4xbf16>, vector<4x128xbf16>, vector<8x128xf32> -> vector<8x128xf32>
    %83 = arith.addf %80, %82 : vector<8x128xf32>
    %84 = vector.extract_strided_slice %5 {offsets = [0, 1], sizes = [4, 128], strides = [1, 1]} : vector<4x256xbf16> to vector<4x128xbf16>
    %cst_53 = arith.constant dense<0.000000e+00> : vector<8x128xf32>
    %85 = tpu.matmul %13, %84, %cst_53 {dimension_numbers = #tpu.dot_dimension_numbers<[1], [0], [0], [1], [0, 0, 1, 1], [], []>} : vector<8x4xbf16>, vector<4x128xbf16>, vector<8x128xf32> -> vector<8x128xf32>
    %86 = arith.addf %83, %85 : vector<8x128xf32>
    %87 = vector.extract_strided_slice %1 {offsets = [0, 9], sizes = [4, 128], strides = [1, 1]} : vector<4x256xbf16> to vector<4x128xbf16>
    %cst_54 = arith.constant dense<0.000000e+00> : vector<8x128xf32>
    %88 = tpu.matmul %15, %87, %cst_54 {dimension_numbers = #tpu.dot_dimension_numbers<[1], [0], [0], [1], [0, 0, 1, 1], [], []>} : vector<8x4xbf16>, vector<4x128xbf16>, vector<8x128xf32> -> vector<8x128xf32>
    %89 = arith.addf %86, %88 : vector<8x128xf32>
    %90 = vector.extract_strided_slice %3 {offsets = [0, 9], sizes = [4, 128], strides = [1, 1]} : vector<4x256xbf16> to vector<4x128xbf16>
    %cst_55 = arith.constant dense<0.000000e+00> : vector<8x128xf32>
    %91 = tpu.matmul %17, %90, %cst_55 {dimension_numbers = #tpu.dot_dimension_numbers<[1], [0], [0], [1], [0, 0, 1, 1], [], []>} : vector<8x4xbf16>, vector<4x128xbf16>, vector<8x128xf32> -> vector<8x128xf32>
    %92 = arith.addf %89, %91 : vector<8x128xf32>
    %93 = vector.extract_strided_slice %1 {offsets = [0, 10], sizes = [4, 128], strides = [1, 1]} : vector<4x256xbf16> to vector<4x128xbf16>
    %cst_56 = arith.constant dense<0.000000e+00> : vector<8x128xf32>
    %94 = tpu.matmul %19, %93, %cst_56 {dimension_numbers = #tpu.dot_dimension_numbers<[1], [0], [0], [1], [0, 0, 1, 1], [], []>} : vector<8x4xbf16>, vector<4x128xbf16>, vector<8x128xf32> -> vector<8x128xf32>
    %95 = arith.addf %92, %94 : vector<8x128xf32>
    %96 = vector.extract_strided_slice %5 {offsets = [0, 9], sizes = [4, 128], strides = [1, 1]} : vector<4x256xbf16> to vector<4x128xbf16>
    %cst_57 = arith.constant dense<0.000000e+00> : vector<8x128xf32>
    %97 = tpu.matmul %21, %96, %cst_57 {dimension_numbers = #tpu.dot_dimension_numbers<[1], [0], [0], [1], [0, 0, 1, 1], [], []>} : vector<8x4xbf16>, vector<4x128xbf16>, vector<8x128xf32> -> vector<8x128xf32>
    %98 = arith.addf %95, %97 : vector<8x128xf32>
    %99 = vector.extract_strided_slice %7 {offsets = [0, 9], sizes = [4, 128], strides = [1, 1]} : vector<4x256xbf16> to vector<4x128xbf16>
    %cst_58 = arith.constant dense<0.000000e+00> : vector<8x128xf32>
    %100 = tpu.matmul %23, %99, %cst_58 {dimension_numbers = #tpu.dot_dimension_numbers<[1], [0], [0], [1], [0, 0, 1, 1], [], []>} : vector<8x4xbf16>, vector<4x128xbf16>, vector<8x128xf32> -> vector<8x128xf32>
    %101 = arith.addf %98, %100 : vector<8x128xf32>
    %102 = vector.extract_strided_slice %5 {offsets = [0, 10], sizes = [4, 128], strides = [1, 1]} : vector<4x256xbf16> to vector<4x128xbf16>
    %cst_59 = arith.constant dense<0.000000e+00> : vector<8x128xf32>
    %103 = tpu.matmul %25, %102, %cst_59 {dimension_numbers = #tpu.dot_dimension_numbers<[1], [0], [0], [1], [0, 0, 1, 1], [], []>} : vector<8x4xbf16>, vector<4x128xbf16>, vector<8x128xf32> -> vector<8x128xf32>
    %104 = arith.addf %101, %103 : vector<8x128xf32>
    %105 = arith.maximumf %78, %104 : vector<8x128xf32>
    %106 = vector.extract_strided_slice %7 {offsets = [0, 0], sizes = [4, 128], strides = [1, 1]} : vector<4x256xbf16> to vector<4x128xbf16>
    %cst_60 = arith.constant dense<0.000000e+00> : vector<8x128xf32>
    %107 = tpu.matmul %9, %106, %cst_60 {dimension_numbers = #tpu.dot_dimension_numbers<[1], [0], [0], [1], [0, 0, 1, 1], [], []>} : vector<8x4xbf16>, vector<4x128xbf16>, vector<8x128xf32> -> vector<8x128xf32>
    %108 = vector.extract_strided_slice %5 {offsets = [0, 1], sizes = [4, 128], strides = [1, 1]} : vector<4x256xbf16> to vector<4x128xbf16>
    %cst_61 = arith.constant dense<0.000000e+00> : vector<8x128xf32>
    %109 = tpu.matmul %11, %108, %cst_61 {dimension_numbers = #tpu.dot_dimension_numbers<[1], [0], [0], [1], [0, 0, 1, 1], [], []>} : vector<8x4xbf16>, vector<4x128xbf16>, vector<8x128xf32> -> vector<8x128xf32>
    %110 = arith.addf %107, %109 : vector<8x128xf32>
    %111 = vector.extract_strided_slice %7 {offsets = [0, 1], sizes = [4, 128], strides = [1, 1]} : vector<4x256xbf16> to vector<4x128xbf16>
    %cst_62 = arith.constant dense<0.000000e+00> : vector<8x128xf32>
    %112 = tpu.matmul %13, %111, %cst_62 {dimension_numbers = #tpu.dot_dimension_numbers<[1], [0], [0], [1], [0, 0, 1, 1], [], []>} : vector<8x4xbf16>, vector<4x128xbf16>, vector<8x128xf32> -> vector<8x128xf32>
    %113 = arith.addf %110, %112 : vector<8x128xf32>
    %114 = vector.extract_strided_slice %3 {offsets = [0, 9], sizes = [4, 128], strides = [1, 1]} : vector<4x256xbf16> to vector<4x128xbf16>
    %cst_63 = arith.constant dense<0.000000e+00> : vector<8x128xf32>
    %115 = tpu.matmul %15, %114, %cst_63 {dimension_numbers = #tpu.dot_dimension_numbers<[1], [0], [0], [1], [0, 0, 1, 1], [], []>} : vector<8x4xbf16>, vector<4x128xbf16>, vector<8x128xf32> -> vector<8x128xf32>
    %116 = arith.addf %113, %115 : vector<8x128xf32>
    %117 = vector.extract_strided_slice %1 {offsets = [0, 10], sizes = [4, 128], strides = [1, 1]} : vector<4x256xbf16> to vector<4x128xbf16>
    %cst_64 = arith.constant dense<0.000000e+00> : vector<8x128xf32>
    %118 = tpu.matmul %17, %117, %cst_64 {dimension_numbers = #tpu.dot_dimension_numbers<[1], [0], [0], [1], [0, 0, 1, 1], [], []>} : vector<8x4xbf16>, vector<4x128xbf16>, vector<8x128xf32> -> vector<8x128xf32>
    %119 = arith.addf %116, %118 : vector<8x128xf32>
    %120 = vector.extract_strided_slice %3 {offsets = [0, 10], sizes = [4, 128], strides = [1, 1]} : vector<4x256xbf16> to vector<4x128xbf16>
    %cst_65 = arith.constant dense<0.000000e+00> : vector<8x128xf32>
    %121 = tpu.matmul %19, %120, %cst_65 {dimension_numbers = #tpu.dot_dimension_numbers<[1], [0], [0], [1], [0, 0, 1, 1], [], []>} : vector<8x4xbf16>, vector<4x128xbf16>, vector<8x128xf32> -> vector<8x128xf32>
    %122 = arith.addf %119, %121 : vector<8x128xf32>
    %123 = vector.extract_strided_slice %7 {offsets = [0, 9], sizes = [4, 128], strides = [1, 1]} : vector<4x256xbf16> to vector<4x128xbf16>
    %cst_66 = arith.constant dense<0.000000e+00> : vector<8x128xf32>
    %124 = tpu.matmul %21, %123, %cst_66 {dimension_numbers = #tpu.dot_dimension_numbers<[1], [0], [0], [1], [0, 0, 1, 1], [], []>} : vector<8x4xbf16>, vector<4x128xbf16>, vector<8x128xf32> -> vector<8x128xf32>
    %125 = arith.addf %122, %124 : vector<8x128xf32>
    %126 = vector.extract_strided_slice %5 {offsets = [0, 10], sizes = [4, 128], strides = [1, 1]} : vector<4x256xbf16> to vector<4x128xbf16>
    %cst_67 = arith.constant dense<0.000000e+00> : vector<8x128xf32>
    %127 = tpu.matmul %23, %126, %cst_67 {dimension_numbers = #tpu.dot_dimension_numbers<[1], [0], [0], [1], [0, 0, 1, 1], [], []>} : vector<8x4xbf16>, vector<4x128xbf16>, vector<8x128xf32> -> vector<8x128xf32>
    %128 = arith.addf %125, %127 : vector<8x128xf32>
    %129 = vector.extract_strided_slice %7 {offsets = [0, 10], sizes = [4, 128], strides = [1, 1]} : vector<4x256xbf16> to vector<4x128xbf16>
    %cst_68 = arith.constant dense<0.000000e+00> : vector<8x128xf32>
    %130 = tpu.matmul %25, %129, %cst_68 {dimension_numbers = #tpu.dot_dimension_numbers<[1], [0], [0], [1], [0, 0, 1, 1], [], []>} : vector<8x4xbf16>, vector<4x128xbf16>, vector<8x128xf32> -> vector<8x128xf32>
    %131 = arith.addf %128, %130 : vector<8x128xf32>
    %132 = arith.maximumf %105, %131 : vector<8x128xf32>
    %c0_69 = arith.constant 0 : index
    %c0_70 = arith.constant 0 : index
    %133 = vector.load %arg3[%c0_69, %c0_70] : memref<8x1xf32, #tpu.memory_space<vmem>>, vector<8x1xf32>
    %134 = vector.broadcast %133 : vector<8x1xf32> to vector<8x128xf32>
    %135 = arith.addf %132, %134 : vector<8x128xf32>
    %cst_71 = arith.constant 0.000000e+00 : f32
    %136 = vector.broadcast %cst_71 : f32 to vector<8x128xf32>
    %137 = arith.maximumf %135, %136 : vector<8x128xf32>
    %c0_72 = arith.constant 0 : index
    %c0_73 = arith.constant 0 : index
    %c0_74 = arith.constant 0 : index
    %138 = vector.load %arg4[%c0_72, %c0_73, %c0_74] : memref<1x8x128xf32, #tpu.memory_space<vmem>>, vector<1x8x128xf32>
    %139 = vector.shape_cast %138 : vector<1x8x128xf32> to vector<8x128xf32>
    %140 = vector.shape_cast %137 : vector<8x128xf32> to vector<1x8x128xf32>
    tpu.vector_store %arg4[%c0_72, %c0_73, %c0_74], %140 {strides = array<i32>} : memref<1x8x128xf32, #tpu.memory_space<vmem>>, vector<1x8x128xf32>,
    return
  }
  func.func @transform_0(%arg0: i32) -> (i32, i32, i32, i32) {
    %c0_i32 = arith.constant 0 : i32
    %c0_i32_0 = arith.constant 0 : i32
    %c0_i32_1 = arith.constant 0 : i32
    %c0_i32_2 = arith.constant 0 : i32
    return %arg0, %c0_i32, %c0_i32_0, %c0_i32_1 : i32, i32, i32, i32
  }
  func.func @transform_1(%arg0: i32) -> (i32, i32, i32) {
    %c0_i32 = arith.constant 0 : i32
    %c0_i32_0 = arith.constant 0 : i32
    %c0_i32_1 = arith.constant 0 : i32
    %c0_i32_2 = arith.constant 0 : i32
    return %c0_i32, %c0_i32_0, %c0_i32_1 : i32, i32, i32
  }
  func.func @transform_2(%arg0: i32) -> (i32, i32) {
    %c0_i32 = arith.constant 0 : i32
    %c0_i32_0 = arith.constant 0 : i32
    %c0_i32_1 = arith.constant 0 : i32
    return %c0_i32, %c0_i32_0 : i32, i32
  }
  func.func @transform_3(%arg0: i32) -> (i32, i32, i32) {
    %c0_i32 = arith.constant 0 : i32
    %c0_i32_0 = arith.constant 0 : i32
    %c0_i32_1 = arith.constant 0 : i32
    return %arg0, %c0_i32, %c0_i32_0 : i32, i32, i32
  }
}

</mosaic_0001>

<bundles_post_ra>
// kernel: cnn_block.1
= control target key start
LH: loop header
LB: loop body
LE: loop exit
PB: predicated region body
PF: predicated region fallthrough
CT: control target
= control target key end

     0   :  { %s1253_s12 = smov 0   ;;  %s1564_s0 = inlined_call_operand.vmem [shape: bf16[2,4,4,256], index: 0, kind: input, shape index: {}]   ;;  %s1565_s1 = inlined_call_operand.vmem [shape: bf16[9,8,4], index: 1, kind: input, shape index: {}]   ;;  %s1566_s2 = inlined_call_operand.vmem [shape: f32[8,1], index: 2, kind: input, shape index: {}]   ;;  %s1567_s3 = inlined_call_operand.vmem [shape: f32[2,8,128], index: 3, kind: output, shape index: {}]  }
   0x1 LB: > { %s1150_s13 = sadd.s32 4294967295, %s1227_s12   ;;  %p1154_p0 = scmp.ge.s32.totalorder %s1227_s12, 1  ;;  %s1227_s12 = sphi %s1253_s12, %s13_s12  }
   0x2   : > { %p137_p1 = scmp.lt.s32.totalorder %s1227_s12, 3 }
   0x4   : > { %p138_p2 = pnand %p1154_p0, %p137_p1 }
   0x5   : > { %p160_p3 = scmp.lt.s32.totalorder (!%p138_p2), %s1150_s13, 1  ;;  %s1229_s18 = smov (!%p138_p2), 127  }
   0x6   : > { %141 = sbr.rel (%p138_p2) target bundleno = 492 (0x1ec), region = 32  ;;  %s1230_s19 = smov (!%p138_p2), 119  }
   0x7   : > { %s1231_s20 = smov (!%p138_p2), 118  }
   0xb   : > { %s1569_s13 = smov (!%p160_p3, %s1150_s13), 1  ;;  %vm198_vm0 = vcmask 1041408   ;;  %v1338_v38 = vld [vmem:[%s1565_s1 + $0x4] sm:$0xf]  ;;  %vm194_vm1 = vcmask 31744   ;;  %vm243_vm2 = vcmask 1039360  }
   0xc   : > { %s1207_s14 = sshll.u32 %s1569_s13, 4  ;;  %v1343_v39 = vld [vmem:[%s1565_s1] sm:$0xf]  ;;  %v1356_v42 = vld [vmem:[%s1565_s1 + $0xc] sm:$0xf]  ;;  %vm344_vm3 = vcmask 973824  }
   0xd   : > { %s1267_s17 = scalar_lea.vmem %s1564_s0, %s1207_s14  ;;  %v1365_v48 = vld [vmem:[%s1565_s1 + $0x8] sm:$0xf]  ;;  %v1381_v55 = vld [vmem:[%s1565_s1 + $0x10] sm:$0xf]  ;;  %v1389_v58 = vld [vmem:[%s1565_s1 + $0x14] sm:$0xf] }
   0xe   : > { %v1270_v0 = vld [vmem:[%s1267_s17] sm:$0xf]  ;;  %v1274_v1 = vld [vmem:[%s1267_s17 + $0x8] sm:$0xf]  ;;  %v1282_v6 = vld [vmem:[%s1267_s17 + $0x4] sm:$0xf] }
   0xf   : > { %234 = vst [vmem:[#allocation1] ss:$4 sm:$0xff] %v1270_v0  ;;  %v1301_v17 = vld [vmem:[%s1267_s17 + $0xc] sm:$0xf]  ;;  %v200_v34 = vsel %vm198_vm0, %v1282_v6, 0  ;;  %v219_v35 = vsel %vm198_vm0, %v1270_v0, 0 }
  0x10   : > { %v1333_v36 = vsel %vm198_vm0, %v1274_v1, 0  ;;  %209 = vmatpush.bf16.msra.mxu0 %v200_v34  ;;  %228 = vmatpush.bf16.msra.mxu1 %v219_v35  ;;  %v1372_v51 = vsel %vm198_vm0, %v1301_v17, 0  ;;  %vm405_vm4 = vcmask 965632   ;;  %s1157_s16 = sshll.u32 %s1569_s13, 3 }
  0x11   : > { %278 = vmatpush.bf16.msra.mxu3 %v1333_v36 }
  0x13   : > { %1169 = vmatmul.msk.bf16.vlgmr.msra.gmra.mxu0 %vm194_vm1, %v1338_v38  ;;  %1170 = vmatmul.msk.bf16.vlgmr.msra.gmra.mxu1 %vm194_vm1, %v1343_v39 }
  0x14   : > { %1172 = vmatmul.msk.bf16.vlgmr.msra.gmra.mxu3 %vm194_vm1, %v1356_v42  ;;  %298 = vmatpush.bf16.msrb.mxu0 %v1372_v51 }
  0x16   : > { %v235_v2 = vld.sshfl [vmem:[#allocation1] sm:$0xff pattern:$0x73625140]  ;;  %v237_v3 = vld.sshfl [vmem:[#allocation1 + $0x8] sm:$0xff pattern:$0x73625140] }
  0x17   : > { %239 = vrot.lane.b32.xlu0 %v235_v2, %s1229_s18  ;;  %305 = vst [vmem:[#allocation1] ss:$4 sm:$0xff] %v1274_v1 }
  0x1e   : > { %v308_v4 = vld.sshfl [vmem:[#allocation1 + $0x8] sm:$0xff pattern:$0x73625140]  ;;  %v306_v5 = vld.sshfl [vmem:[#allocation1] sm:$0xff pattern:$0x73625140] }
  0x1f   : > { %241 = vrot.lane.b32.xlu0 %v237_v3, %s1229_s18  ;;  %312 = vrot.lane.b32.xlu1 %v308_v4, %s1229_s18  ;;  %335 = vst [vmem:[#allocation1] ss:$4 sm:$0xff] %v1270_v0  ;;  %v1402_v3 = vld [vmem:[%s1565_s1 + $0x1c] sm:$0xf] }
  0x23   : > { %1173 = vmatmul.msk.bf16.vlgmr.msrb.gmra.mxu0 %vm194_vm1, %v1381_v55 }
  0x26   : > { %v336_v7 = vld.sshfl [vmem:[#allocation1] sm:$0xff pattern:$0x73625140]  ;;  %v338_v8 = vld.sshfl [vmem:[#allocation1 + $0x8] sm:$0xff pattern:$0x73625140] }
  0x27   : > { %340 = vrot.lane.b32.xlu1 %v336_v7, %s1230_s19  ;;  %310 = vrot.lane.b32.xlu0 %v306_v5, %s1229_s18  ;;  %366 = vst [vmem:[#allocation1] ss:$4 sm:$0xff] %v1282_v6  ;;  %v1410_v5 = vld [vmem:[%s1565_s1 + $0x18] sm:$0xf] }
  0x2e   : > { %v367_v9 = vld.sshfl [vmem:[#allocation1] sm:$0xff pattern:$0x73625140]  ;;  %v369_v10 = vld.sshfl [vmem:[#allocation1 + $0x8] sm:$0xff pattern:$0x73625140] }
  0x2f   : > { %342 = vrot.lane.b32.xlu1 %v338_v8, %s1230_s19  ;;  %396 = vst [vmem:[#allocation1] ss:$4 sm:$0xff] %v1270_v0  ;;  %371 = vrot.lane.b32.xlu2 %v367_v9, %s1230_s19 }
  0x36   : > { %v399_v11 = vld.sshfl [vmem:[#allocation1 + $0x8] sm:$0xff pattern:$0x73625140]  ;;  %v397_v12 = vld.sshfl [vmem:[#allocation1] sm:$0xff pattern:$0x73625140] }
  0x37   : > { %403 = vrot.lane.b32.xlu0 %v399_v11, %s1231_s20  ;;  %427 = vst [vmem:[#allocation1] ss:$4 sm:$0xff] %v1270_v0  ;;  %373 = vrot.lane.b32.xlu2 %v369_v10, %s1230_s19 }
  0x3e   : > { %v430_v13 = vld.sshfl [vmem:[#allocation1 + $0x8] sm:$0xff pattern:$0x73625140]  ;;  %v428_v14 = vld.sshfl [vmem:[#allocation1] sm:$0xff pattern:$0x73625140] }
  0x3f   : > { %434 = vrot.lane.b32.xlu1 %v430_v13, %s1229_s18  ;;  %432 = vrot.lane.b32.xlu0 %v428_v14, %s1229_s18  ;;  %466 = vst [vmem:[#allocation1] ss:$4 sm:$0xff] %v1282_v6  ;;  %v1422_v13 = vld [vmem:[%s1565_s1 + $0x20] sm:$0xf] }
  0x40   : > { %401 = vrot.lane.b32.xlu2 %v397_v12, %s1231_s20 }
  0x46   : > { %v467_v15 = vld.sshfl [vmem:[#allocation1] sm:$0xff pattern:$0x73625140]  ;;  %v469_v16 = vld.sshfl [vmem:[#allocation1 + $0x8] sm:$0xff pattern:$0x73625140] }
  0x47   : > { %471 = vrot.lane.b32.xlu1 %v467_v15, %s1229_s18  ;;  %507 = vst [vmem:[#allocation1] ss:$4 sm:$0xff] %v1274_v1 }
  0x48   : > { %473 = vrot.lane.b32.xlu2 %v469_v16, %s1229_s18 }
  0x4e   : > { %v508_v18 = vld.sshfl [vmem:[#allocation1] sm:$0xff pattern:$0x73625140]  ;;  %v510_v19 = vld.sshfl [vmem:[#allocation1 + $0x8] sm:$0xff pattern:$0x73625140] }
  0x4f   : > { %512 = vrot.lane.b32.xlu0 %v508_v18, %s1229_s18  ;;  %514 = vrot.lane.b32.xlu1 %v510_v19, %s1229_s18  ;;  %534 = vst [vmem:[#allocation1] ss:$4 sm:$0xff] %v1301_v17 }
  0x56   : > { %v537_v20 = vld.sshfl [vmem:[#allocation1 + $0x8] sm:$0xff pattern:$0x73625140]  ;;  %v535_v21 = vld.sshfl [vmem:[#allocation1] sm:$0xff pattern:$0x73625140] }
  0x57   : > { %541 = vrot.lane.b32.xlu0 %v537_v20, %s1229_s18  ;;  %561 = vst [vmem:[#allocation1] ss:$4 sm:$0xff] %v1282_v6  ;;  %539 = vrot.lane.b32.xlu2 %v535_v21, %s1229_s18 }
  0x5e   : > { %v562_v22 = vld.sshfl [vmem:[#allocation1] sm:$0xff pattern:$0x73625140]  ;;  %v564_v23 = vld.sshfl [vmem:[#allocation1 + $0x8] sm:$0xff pattern:$0x73625140] }
  0x5f   : > { %566 = vrot.lane.b32.xlu1 %v562_v22, %s1230_s19  ;;  %588 = vst [vmem:[#allocation1] ss:$4 sm:$0xff] %v1270_v0  ;;  %568 = vrot.lane.b32.xlu2 %v564_v23, %s1230_s19 }
  0x66   : > { %v591_v24 = vld.sshfl [vmem:[#allocation1 + $0x8] sm:$0xff pattern:$0x73625140]  ;;  %v589_v25 = vld.sshfl [vmem:[#allocation1] sm:$0xff pattern:$0x73625140] }
  0x67   : > { %595 = vrot.lane.b32.xlu0 %v591_v24, %s1231_s20  ;;  %615 = vst [vmem:[#allocation1] ss:$4 sm:$0xff] %v1282_v6  ;;  %593 = vrot.lane.b32.xlu2 %v589_v25, %s1231_s20 }
  0x6e   : > { %v616_v26 = vld.sshfl [vmem:[#allocation1] sm:$0xff pattern:$0x73625140]  ;;  %v618_v27 = vld.sshfl [vmem:[#allocation1 + $0x8] sm:$0xff pattern:$0x73625140] }
  0x6f   : > { %620 = vrot.lane.b32.xlu1 %v616_v26, %s1231_s20  ;;  %669 = vst [vmem:[#allocation1] ss:$4 sm:$0xff] %v1274_v1  ;;  %622 = vrot.lane.b32.xlu2 %v618_v27, %s1231_s20 }
  0x76   : > { %v672_v28 = vld.sshfl [vmem:[#allocation1 + $0x8] sm:$0xff pattern:$0x73625140]  ;;  %v670_v29 = vld.sshfl [vmem:[#allocation1] sm:$0xff pattern:$0x73625140] }
  0x77   : > { %676 = vrot.lane.b32.xlu0 %v672_v28, %s1229_s18  ;;  %696 = vst [vmem:[#allocation1] ss:$4 sm:$0xff] %v1270_v0  ;;  %674 = vrot.lane.b32.xlu2 %v670_v29, %s1229_s18 }
  0x7e   : > { %v699_v30 = vld.sshfl [vmem:[#allocation1 + $0x8] sm:$0xff pattern:$0x73625140]  ;;  %v697_v31 = vld.sshfl [vmem:[#allocation1] sm:$0xff pattern:$0x73625140] }
  0x7f   : > { %703 = vrot.lane.b32.xlu1 %v699_v30, %s1230_s19  ;;  %701 = vrot.lane.b32.xlu0 %v697_v31, %s1230_s19  ;;  %723 = vst [vmem:[#allocation1] ss:$4 sm:$0xff] %v1282_v6 }
  0x86   : > { %v726_v32 = vld.sshfl [vmem:[#allocation1 + $0x8] sm:$0xff pattern:$0x73625140]  ;;  %v724_v33 = vld.sshfl [vmem:[#allocation1] sm:$0xff pattern:$0x73625140] }
  0x87   : > { %730 = vrot.lane.b32.xlu1 %v726_v32, %s1230_s19  ;;  %728 = vrot.lane.b32.xlu0 %v724_v33, %s1230_s19  ;;  %750 = vst [vmem:[#allocation1] ss:$4 sm:$0xff] %v1270_v0 }
  0x89   : > { %v240_v37 = vpop.permute.xlu0 %239  ;;  %v372_v46 = vpop.permute.xlu2 %371 }
  0x8e   : > { %v751_v40 = vld.sshfl [vmem:[#allocation1] sm:$0xff pattern:$0x73625140]  ;;  %v753_v41 = vld.sshfl [vmem:[#allocation1 + $0x8] sm:$0xff pattern:$0x73625140] }
  0x8f   : > { %777 = vst [vmem:[#allocation1] ss:$4 sm:$0xff] %v1274_v1  ;;  %755 = vrot.lane.b32.xlu1 %v751_v40, %s1231_s20  ;;  %757 = vrot.lane.b32.xlu2 %v753_v41, %s1231_s20 }
  0x91   : > { %v242_v43 = vpop.permute.xlu0 %241  ;;  %v313_v44 = vpop.permute.xlu1 %312 }
  0x92   : > { %v244_v45 = vsel %vm243_vm2, %v240_v37, %v242_v43  ;;  %v374_v57 = vpop.permute.xlu2 %373 }
  0x93   : > { %v249_v47 = vsel %vm198_vm0, %v244_v45, 0  ;;  %v375_v61 = vsel %vm344_vm3, %v372_v46, %v374_v57 }
  0x94   : > { %258 = vmatpush.bf16.msra.mxu2 %v249_v47  ;;  %v380_v62 = vsel %vm198_vm0, %v375_v61, 0 }
  0x95   : > { %389 = vmatpush.bf16.msrb.mxu3 %v380_v62 }
  0x96   : > { %v778_v49 = vld.sshfl [vmem:[#allocation1] sm:$0xff pattern:$0x73625140]  ;;  %v780_v50 = vld.sshfl [vmem:[#allocation1 + $0x8] sm:$0xff pattern:$0x73625140] }
  0x97   : > { %804 = vst [vmem:[#allocation1] ss:$4 sm:$0xff] %v1301_v17  ;;  %782 = vrot.lane.b32.xlu1 %v778_v49, %s1230_s19  ;;  %784 = vrot.lane.b32.xlu2 %v780_v50, %s1230_s19 }
  0x98   : > { %1171 = vmatmul.msk.bf16.vlgmr.msra.gmra.mxu2 %vm194_vm1, %v1365_v48  ;;  %1176 = vmatmul.msk.bf16.vlgmr.msrb.gmra.mxu3 %vm194_vm1, %v1402_v3 }
  0x99   : > { %v341_v52 = vpop.permute.xlu1 %340  ;;  %v311_v53 = vpop.permute.xlu0 %310 }
  0x9a   : > { %v314_v54 = vsel %vm243_vm2, %v311_v53, %v313_v44  ;;  %v402_v9 = vpop.permute.xlu2 %401 }
  0x9b   : > { %v319_v56 = vsel %vm198_vm0, %v314_v54, 0 }
  0x9c   : > { %328 = vmatpush.bf16.msrb.mxu1 %v319_v56 }
  0x9e   : > { %v807_v59 = vld.sshfl [vmem:[#allocation1 + $0x8] sm:$0xff pattern:$0x73625140]  ;;  %v805_v60 = vld.sshfl [vmem:[#allocation1] sm:$0xff pattern:$0x73625140] }
  0x9f   : > { %811 = vrot.lane.b32.xlu0 %v807_v59, %s1230_s19  ;;  %831 = vst [vmem:[#allocation1] ss:$4 sm:$0xff] %v1274_v1  ;;  %809 = vrot.lane.b32.xlu2 %v805_v60, %s1230_s19 }
  0xa0   : > { %1174 = vmatmul.msk.bf16.vlgmr.msrb.gmra.mxu1 %vm194_vm1, %v1389_v58 }
  0xa1   : > { %v343_v63 = vpop.permute.xlu1 %342 }
  0xa2   : > { %v345_v2 = vsel %vm344_vm3, %v341_v52, %v343_v63  ;;  %v474_v23 = vpop.permute.xlu2 %473 }
  0xa3   : > { %v350_v4 = vsel %vm198_vm0, %v345_v2, 0 }
  0xa4   : > { %359 = vmatpush.bf16.msrb.mxu2 %v350_v4 }
  0xa6   : > { %v834_v7 = vld.sshfl [vmem:[#allocation1 + $0x8] sm:$0xff pattern:$0x73625140]  ;;  %v832_v8 = vld.sshfl [vmem:[#allocation1] sm:$0xff pattern:$0x73625140] }
  0xa7   : > { %838 = vrot.lane.b32.xlu0 %v834_v7, %s1231_s20  ;;  %836 = vrot.lane.b32.xlu2 %v832_v8, %s1231_s20  ;;  %859 = vst [vmem:[#allocation1] ss:$4 sm:$0xff] %v1274_v1 }
  0xa8   : > { %460 = vmatpush.bf16.msra.mxu2 %v200_v34 }
  0xa9   : > { %1175 = vmatmul.msk.bf16.vlgmr.msrb.gmra.mxu2 %vm194_vm1, %v1410_v5  ;;  %v404_v10 = vpop.permute.xlu0 %403 }
  0xaa   : > { %v406_v11 = vsel %vm405_vm4, %v402_v9, %v404_v10 }
  0xab   : > { %v411_v12 = vsel %vm198_vm0, %v406_v11, 0 }
  0xac   : > { %420 = vmatpush.bf16.msra.mxu0 %v411_v12 }
  0xae   : > { %v862_v14 = vld.sshfl [vmem:[#allocation1 + $0x8] sm:$0xff pattern:$0x73625140]  ;;  %v860_v15 = vld.sshfl [vmem:[#allocation1] sm:$0xff pattern:$0x73625140] }
  0xaf   : > { %866 = vrot.lane.b32.xlu1 %v862_v14, %s1229_s18  ;;  %864 = vrot.lane.b32.xlu0 %v860_v15, %s1229_s18  ;;  %898 = vst [vmem:[#allocation1] ss:$4 sm:$0xff] %v1301_v17 }
  0xb0   : > { %500 = vmatpush.bf16.msrb.mxu0 %v1372_v51 }
  0xb1   : > { %1177 = vmatmul.msk.bf16.vlgmr.msra.gmra.mxu0 %vm194_vm1, %v1422_v13  ;;  %v435_v16 = vpop.permute.xlu1 %434  ;;  %v433_v18 = vpop.permute.xlu0 %432 }
  0xb2   : > { %v436_v19 = vsel %vm243_vm2, %v433_v18, %v435_v16  ;;  %v540_v29 = vpop.permute.xlu2 %539 }
  0xb3   : > { %v438_v20 = vsel %vm198_vm0, %v436_v19, 0 }
  0xb4   : > { %447 = vmatpush.bf16.msra.mxu1 %v438_v20 }
  0xb6   : > { %v899_v21 = vld.sshfl [vmem:[#allocation1] sm:$0xff pattern:$0x73625140]  ;;  %v901_v22 = vld.sshfl [vmem:[#allocation1 + $0x8] sm:$0xff pattern:$0x73625140] }
  0xb7   : > { %925 = vst [vmem:[#allocation1] ss:$4 sm:$0xff] %v1282_v6  ;;  %905 = vrot.lane.b32.xlu0 %v901_v22, %s1229_s18  ;;  %903 = vrot.lane.b32.xlu2 %v899_v21, %s1229_s18 }
  0xb8   : > { %1178 = vmatmul.msk.bf16.vlgmr.msra.gmra.mxu1 %vm194_vm1, %v1338_v38 }
  0xb9   : > { %1179 = vmatmul.msk.bf16.vlgmr.msra.gmra.mxu2 %vm194_vm1, %v1343_v39  ;;  %v472_v24 = vpop.permute.xlu1 %471 }
  0xba   : > { %v475_v25 = vsel %vm243_vm2, %v472_v24, %v474_v23  ;;  %v569_v40 = vpop.permute.xlu2 %568  ;;  %v211_v23 = vpop.f32.mrf.mxu0 }
  0xbb   : > { %v477_v26 = vsel %vm198_vm0, %v475_v25, 0  ;;  %v230_v25 = vpop.f32.mrf.mxu1 }
  0xbc   : > { %486 = vmatpush.bf16.msra.mxu3 %v477_v26 }
  0xbe   : > { %v926_v27 = vld.sshfl [vmem:[#allocation1] sm:$0xff pattern:$0x73625140]  ;;  %v928_v28 = vld.sshfl [vmem:[#allocation1 + $0x8] sm:$0xff pattern:$0x73625140] }
  0xbf   : > { %930 = vrot.lane.b32.xlu1 %v926_v27, %s1230_s19  ;;  %952 = vst [vmem:[#allocation1] ss:$4 sm:$0xff] %v1270_v0  ;;  %1180 = vmatmul.msk.bf16.vlgmr.msra.gmra.mxu3 %vm194_vm1, %v1365_v48  ;;  %v231_v27 = vadd.f32 %v230_v25, %v211_v23  ;;  %v1232_v23 = vmov 0  }
  0xc0   : > { %932 = vrot.lane.b32.xlu2 %v928_v28, %s1230_s19  ;;  %1220 = vset.pattern.permute.xlu0 %v1232_v23 }
  0xc1   : > { %1181 = vmatmul.msk.bf16.vlgmr.msrb.gmra.mxu0 %vm194_vm1, %v1356_v42  ;;  %v513_v30 = vpop.permute.xlu0 %512  ;;  %v515_v31 = vpop.permute.xlu1 %514 }
  0xc2   : > { %v516_v32 = vsel %vm243_vm2, %v513_v30, %v515_v31  ;;  %v594_v47 = vpop.permute.xlu2 %593  ;;  %v213_v31 = vpop.f32.mrf.mxu0 }
  0xc3   : > { %v518_v33 = vsel %vm198_vm0, %v516_v32, 0  ;;  %v232_v32 = vpop.f32.mrf.mxu1 }
  0xc4   : > { %527 = vmatpush.bf16.msrb.mxu1 %v518_v33 }
  0xc6   : > { %v955_v34 = vld.sshfl [vmem:[#allocation1 + $0x8] sm:$0xff pattern:$0x73625140]  ;;  %v953_v35 = vld.sshfl [vmem:[#allocation1] sm:$0xff pattern:$0x73625140] }
  0xc7   : > { %959 = vrot.lane.b32.xlu1 %v955_v34, %s1231_s20  ;;  %957 = vrot.lane.b32.xlu0 %v953_v35, %s1231_s20  ;;  %979 = vst [vmem:[#allocation1] ss:$4 sm:$0xff] %v1282_v6  ;;  %v280_v34 = vpop.f32.mrf.mxu3 }
  0xc8   : > { %1182 = vmatmul.msk.bf16.vlgmr.msrb.gmra.mxu1 %vm194_vm1, %v1381_v55 }
  0xc9   : > { %v542_v0 = vpop.permute.xlu0 %541 }
  0xca   : > { %v543_v37 = vsel %vm243_vm2, %v540_v29, %v542_v0 }
  0xcb   : > { %v545_v41 = vsel %vm198_vm0, %v543_v37, 0 }
  0xcc   : > { %554 = vmatpush.bf16.msrb.mxu2 %v545_v41 }
  0xce   : > { %v982_v43 = vld.sshfl [vmem:[#allocation1 + $0x8] sm:$0xff pattern:$0x73625140]  ;;  %v980_v44 = vld.sshfl [vmem:[#allocation1] sm:$0xff pattern:$0x73625140] }
  0xcf   : > { %986 = vrot.lane.b32.xlu1 %v982_v43, %s1231_s20  ;;  %984 = vrot.lane.b32.xlu0 %v980_v44, %s1231_s20  ;;  %1006 = vst [vmem:[#allocation1] ss:$4 sm:$0xff] %v1301_v17 }
  0xd0   : > { %650 = vmatpush.bf16.msra.mxu2 %v1372_v51 }
  0xd1   : > { %1183 = vmatmul.msk.bf16.vlgmr.msrb.gmra.mxu2 %vm194_vm1, %v1389_v58  ;;  %v567_v6 = vpop.permute.xlu1 %566 }
  0xd2   : > { %v570_v45 = vsel %vm344_vm3, %v567_v6, %v569_v40 }
  0xd3   : > { %v572_v46 = vsel %vm198_vm0, %v570_v45, 0  ;;  %v282_v45 = vpop.f32.mrf.mxu3 }
  0xd4   : > { %581 = vmatpush.bf16.msrb.mxu3 %v572_v46 }
  0xd6   : > { %v1007_v49 = vld.sshfl [vmem:[#allocation1] sm:$0xff pattern:$0x73625140]  ;;  %v1009_v50 = vld.sshfl [vmem:[#allocation1 + $0x8] sm:$0xff pattern:$0x73625140] }
  0xd7   : > { %1033 = vst [vmem:[#allocation1] ss:$4 sm:$0xff] %v1274_v1  ;;  %1184 = vmatmul.msk.bf16.vlgmr.msrb.gmra.mxu3 %vm194_vm1, %v1410_v5 }
  0xd8   : > { %663 = vmatpush.bf16.msra.mxu3 %v1333_v36  ;;  %v623_v36 = vpop.permute.xlu2 %622 }
  0xd9   : > { %v596_v52 = vpop.permute.xlu0 %595 }
  0xda   : > { %v597_v53 = vsel %vm405_vm4, %v594_v47, %v596_v52 }
  0xdb   : > { %v599_v54 = vsel %vm198_vm0, %v597_v53, 0 }
  0xdc   : > { %608 = vmatpush.bf16.msra.mxu0 %v599_v54 }
  0xde   : > { %v1034_v56 = vld.sshfl [vmem:[#allocation1] sm:$0xff pattern:$0x73625140]  ;;  %v1036_v57 = vld.sshfl [vmem:[#allocation1 + $0x8] sm:$0xff pattern:$0x73625140] }
  0xdf   : > { %1038 = vrot.lane.b32.xlu1 %v1034_v56, %s1231_s20  ;;  %1060 = vst [vmem:[#allocation1] ss:$4 sm:$0xff] %v1301_v17  ;;  %1040 = vrot.lane.b32.xlu2 %v1036_v57, %s1231_s20 }
  0xe0   : > { %1185 = vmatmul.msk.bf16.vlgmr.msra.gmra.mxu0 %vm194_vm1, %v1402_v3  ;;  %v675_v63 = vpop.permute.xlu2 %674 }
  0xe1   : > { %1187 = vmatmul.msk.bf16.vlgmr.msra.gmra.mxu2 %vm194_vm1, %v1338_v38  ;;  %v621_v1 = vpop.permute.xlu1 %620 }
  0xe2   : > { %v624_v59 = vsel %vm405_vm4, %v621_v1, %v623_v36 }
  0xe3   : > { %v626_v60 = vsel %vm198_vm0, %v624_v59, 0 }
  0xe4   : > { %635 = vmatpush.bf16.msra.mxu1 %v626_v60 }
  0xe6   : > { %v1063_v61 = vld.sshfl [vmem:[#allocation1 + $0x8] sm:$0xff pattern:$0x73625140]  ;;  %v1061_v62 = vld.sshfl [vmem:[#allocation1] sm:$0xff pattern:$0x73625140] }
  0xe7   : > { %1011 = vrot.lane.b32.xlu1 %v1007_v49, %s1230_s19  ;;  %1067 = vrot.lane.b32.xlu0 %v1063_v61, %s1231_s20 }
  0xe8   : > { %1065 = vrot.lane.b32.xlu2 %v1061_v62, %s1231_s20  ;;  %1186 = vmatmul.msk.bf16.vlgmr.msra.gmra.mxu1 %vm194_vm1, %v1422_v13 }
  0xe9   : > { %v677_v17 = vpop.permute.xlu0 %676  ;;  %1188 = vmatmul.msk.bf16.vlgmr.msra.gmra.mxu3 %vm194_vm1, %v1343_v39  ;;  %v758_v11 = vpop.permute.xlu2 %757 }
  0xea   : > { %v678_v2 = vsel %vm243_vm2, %v675_v63, %v677_v17 }
  0xeb   : > { %v680_v4 = vsel %vm198_vm0, %v678_v2, 0 }
  0xec   : > { %689 = vmatpush.bf16.msrb.mxu0 %v680_v4 }
  0xf0   : > { %1013 = vrot.lane.b32.xlu2 %v1009_v50, %s1230_s19  ;;  %1189 = vmatmul.msk.bf16.vlgmr.msrb.gmra.mxu0 %vm194_vm1, %v1365_v48  ;;  %s168_s19 = scalar_lea.vmem %s1567_s3, %s1157_s16 }
  0xf1   : > { %v704_v7 = vpop.permute.xlu1 %703  ;;  %v702_v8 = vpop.permute.xlu0 %701 }
  0xf2   : > { %v705_v9 = vsel %vm344_vm3, %v702_v8, %v704_v7  ;;  %v785_v20 = vpop.permute.xlu2 %784 }
  0xf3   : > { %v707_v10 = vsel %vm198_vm0, %v705_v9, 0 }
  0xf4   : > { %716 = vmatpush.bf16.msrb.mxu1 %v707_v10 }
  0xf8   : > { %1190 = vmatmul.msk.bf16.vlgmr.msrb.gmra.mxu1 %vm194_vm1, %v1356_v42 }
  0xf9   : > { %v731_v12 = vpop.permute.xlu1 %730  ;;  %v729_v14 = vpop.permute.xlu0 %728 }
  0xfa   : > { %v732_v15 = vsel %vm344_vm3, %v729_v14, %v731_v12  ;;  %v810_v28 = vpop.permute.xlu2 %809 }
  0xfb   : > { %v734_v16 = vsel %vm198_vm0, %v732_v15, 0 }
  0xfc   : > { %743 = vmatpush.bf16.msrb.mxu2 %v734_v16 }
  0xff   : > { %1191 = vmatmul.msk.bf16.vlgmr.msrb.gmra.mxu2 %vm194_vm1, %v1381_v55 }
 0x101   : > { %v756_v18 = vpop.permute.xlu1 %755 }
 0x102   : > { %v759_v19 = vsel %vm405_vm4, %v756_v18, %v758_v11  ;;  %v837_v35 = vpop.permute.xlu2 %836 }
 0x103   : > { %v761_v21 = vsel %vm198_vm0, %v759_v19, 0 }
 0x104   : > { %770 = vmatpush.bf16.msrb.mxu3 %v761_v21 }
 0x107   : > { %1192 = vmatmul.msk.bf16.vlgmr.msrb.gmra.mxu3 %vm194_vm1, %v1389_v58 }
 0x109   : > { %v783_v22 = vpop.permute.xlu1 %782 }
 0x10a   : > { %v786_v24 = vsel %vm344_vm3, %v783_v22, %v785_v20  ;;  %v1088_v22 = vld [vmem:[%s1566_s2] sm:$0xff] }
 0x10b   : > { %v788_v26 = vsel %vm198_vm0, %v786_v24, 0  ;;  %1091 = vperm.xlu0 %1220, %v1088_v22  }
 0x10c   : > { %797 = vmatpush.bf16.msra.mxu0 %v788_v26 }
 0x10f   : > { %1193 = vmatmul.msk.bf16.vlgmr.msra.gmra.mxu0 %vm194_vm1, %v1410_v5 }
 0x110   : > { %892 = vmatpush.bf16.msrb.mxu0 %v1372_v51  ;;  %v300_v51 = vpop.f32.mrf.mxu0 }
 0x111   : > { %v812_v29 = vpop.permute.xlu0 %811  ;;  %v904_v57 = vpop.permute.xlu2 %903 }
 0x112   : > { %v813_v30 = vsel %vm344_vm3, %v810_v28, %v812_v29 }
 0x113   : > { %v815_v33 = vsel %vm198_vm0, %v813_v30, 0 }
 0x114   : > { %824 = vmatpush.bf16.msra.mxu1 %v815_v33 }
 0x117   : > { %1194 = vmatmul.msk.bf16.vlgmr.msra.gmra.mxu1 %vm194_vm1, %v1402_v3 }
 0x118   : > { %v302_v53 = vpop.f32.mrf.mxu0 }
 0x119   : > { %v839_v0 = vpop.permute.xlu0 %838 }
 0x11a   : > { %v840_v37 = vsel %vm405_vm4, %v837_v35, %v839_v0  ;;  %v933_v2 = vpop.permute.xlu2 %932 }
 0x11b   : > { %v842_v40 = vsel %vm198_vm0, %v840_v37, 0  ;;  %v260_v41 = vpop.f32.mrf.mxu2  ;;  %v391_v1 = vpop.f32.mrf.mxu3 }
 0x11c   : > { %851 = vmatpush.bf16.msra.mxu2 %v842_v40  ;;  %v264_v43 = vadd.f32 %v260_v41, %v231_v27 }
 0x11d   : > { %v330_v44 = vpop.f32.mrf.mxu1 }
 0x11e   : > { %v284_v6 = vadd.f32 %v280_v34, %v264_v43 }
 0x11f   : > { %1195 = vmatmul.msk.bf16.vlgmr.msra.gmra.mxu2 %vm194_vm1, %v1422_v13  ;;  %1197 = vmatmul.msk.bf16.vlgmr.msrb.gmra.mxu0 %vm194_vm1, %v1343_v39 }
 0x120   : > { %v304_v46 = vadd.f32 %v300_v51, %v284_v6 }
 0x121   : > { %v867_v47 = vpop.permute.xlu1 %866  ;;  %v865_v49 = vpop.permute.xlu0 %864 }
 0x122   : > { %v868_v50 = vsel %vm243_vm2, %v865_v49, %v867_v47  ;;  %v334_v52 = vadd.f32 %v330_v44, %v304_v46 }
 0x123   : > { %v870_v54 = vsel %vm198_vm0, %v868_v50, 0  ;;  %v262_v56 = vpop.f32.mrf.mxu2  ;;  %v393_v63 = vpop.f32.mrf.mxu3 }
 0x124   : > { %879 = vmatpush.bf16.msra.mxu3 %v870_v54 }
 0x125   : > { %v332_v36 = vpop.f32.mrf.mxu1 }
 0x127   : > { %1196 = vmatmul.msk.bf16.vlgmr.msra.gmra.mxu3 %vm194_vm1, %v1338_v38 }
 0x129   : > { %v906_v59 = vpop.permute.xlu0 %905 }
 0x12a   : > { %v907_v39 = vsel %vm243_vm2, %v904_v57, %v906_v59 }
 0x12b   : > { %v909_v60 = vsel %vm198_vm0, %v907_v39, 0 }
 0x12c   : > { %v361_v61 = vpop.f32.mrf.mxu2  ;;  %918 = vmatpush.bf16.msrb.mxu1 %v909_v60 }
 0x12d   : > { %v365_v62 = vadd.f32 %v361_v61, %v334_v52 }
 0x12e   : > { %v422_v17 = vpop.f32.mrf.mxu0 }
 0x12f   : > { %1198 = vmatmul.msk.bf16.vlgmr.msrb.gmra.mxu1 %vm194_vm1, %v1365_v48  ;;  %v395_v38 = vadd.f32 %v391_v1, %v365_v62 }
 0x131   : > { %v931_v4 = vpop.permute.xlu1 %930  ;;  %v1529_v10 = vadd.f32 %v422_v17, %v395_v38 }
 0x132   : > { %v934_v7 = vsel %vm344_vm3, %v931_v4, %v933_v2 }
 0x133   : > { %v936_v8 = vsel %vm198_vm0, %v934_v7, 0 }
 0x134   : > { %v363_v9 = vpop.f32.mrf.mxu2  ;;  %945 = vmatpush.bf16.msrb.mxu2 %v936_v8 }
 0x135   : > { %v449_v11 = vpop.f32.mrf.mxu1 }
 0x136   : > { %v424_v12 = vpop.f32.mrf.mxu0 }
 0x137   : > { %1199 = vmatmul.msk.bf16.vlgmr.msrb.gmra.mxu2 %vm194_vm1, %v1356_v42 }
 0x139   : > { %v960_v14 = vpop.permute.xlu1 %959  ;;  %v958_v15 = vpop.permute.xlu0 %957 }
 0x13a   : > { %v961_v16 = vsel %vm405_vm4, %v958_v15, %v960_v14  ;;  %v1041_v27 = vpop.permute.xlu2 %1040 }
 0x13b   : > { %v963_v48 = vsel %vm198_vm0, %v961_v16, 0 }
 0x13c   : > { %v462_v18 = vpop.f32.mrf.mxu2  ;;  %972 = vmatpush.bf16.msrb.mxu3 %v963_v48 }
 0x13d   : > { %v451_v19 = vpop.f32.mrf.mxu1  ;;  %v463_v20 = vadd.f32 %v462_v18, %v449_v11 }
 0x13e   : > { %v502_v21 = vpop.f32.mrf.mxu0 }
 0x13f   : > { %1200 = vmatmul.msk.bf16.vlgmr.msrb.gmra.mxu3 %vm194_vm1, %v1381_v55 }
 0x141   : > { %v987_v42 = vpop.permute.xlu1 %986  ;;  %v985_v24 = vpop.permute.xlu0 %984 }
 0x142   : > { %v988_v25 = vsel %vm405_vm4, %v985_v24, %v987_v42  ;;  %v488_v26 = vpop.f32.mrf.mxu3  ;;  %v1066_v35 = vpop.permute.xlu2 %1065 }
 0x143   : > { %v990_v28 = vsel %vm198_vm0, %v988_v25, 0  ;;  %v492_v29 = vadd.f32 %v488_v26, %v463_v20 }
 0x144   : > { %v464_v30 = vpop.f32.mrf.mxu2  ;;  %999 = vmatpush.bf16.msra.mxu0 %v990_v28 }
 0x145   : > { %v506_v31 = vadd.f32 %v502_v21, %v492_v29  ;;  %v529_v55 = vpop.f32.mrf.mxu1 }
 0x146   : > { %v504_v32 = vpop.f32.mrf.mxu0 }
 0x147   : > { %1201 = vmatmul.msk.bf16.vlgmr.msra.gmra.mxu0 %vm194_vm1, %v1389_v58  ;;  %v533_v33 = vadd.f32 %v529_v55, %v506_v31 }
 0x14a   : > { %v490_v34 = vpop.f32.mrf.mxu3  ;;  %v1014_v44 = vpop.permute.xlu2 %1013 }
 0x14d   : > { %v531_v0 = vpop.f32.mrf.mxu1 }
 0x151   : > { %v1039_v37 = vpop.permute.xlu1 %1038 }
 0x152   : > { %v1042_v51 = vsel %vm405_vm4, %v1039_v37, %v1041_v27 }
 0x153   : > { %v1044_v40 = vsel %vm198_vm0, %v1042_v51, 0 }
 0x154   : > { %v556_v41 = vpop.f32.mrf.mxu2  ;;  %1053 = vmatpush.bf16.msra.mxu2 %v1044_v40 }
 0x155   : > { %v560_v43 = vadd.f32 %v556_v41, %v533_v33 }
 0x157   : > { %1203 = vmatmul.msk.bf16.vlgmr.msra.gmra.mxu2 %vm194_vm1, %v1402_v3 }
 0x159   : > { %v1012_v6 = vpop.permute.xlu1 %1011  ;;  %v1068_v45 = vpop.permute.xlu0 %1067 }
 0x15a   : > { %v1069_v58 = vsel %vm405_vm4, %v1066_v35, %v1068_v45  ;;  %v1015_v46 = vsel %vm344_vm3, %v1012_v6, %v1014_v44  ;;  %v583_v47 = vpop.f32.mrf.mxu3 }
 0x15b   : > { %v1071_v49 = vsel %vm198_vm0, %v1069_v58, 0  ;;  %v1017_v50 = vsel %vm198_vm0, %v1015_v46, 0  ;;  %v587_v52 = vadd.f32 %v583_v47, %v560_v43 }
 0x15c   : > { %v558_v53 = vpop.f32.mrf.mxu2  ;;  %1026 = vmatpush.bf16.msra.mxu1 %v1017_v50  ;;  %1080 = vmatpush.bf16.msra.mxu3 %v1071_v49 }
 0x15d   : > { %v610_v54 = vpop.f32.mrf.mxu0 }
 0x15e   : > { %v614_v56 = vadd.f32 %v610_v54, %v587_v52 }
 0x15f   : > { %1202 = vmatmul.msk.bf16.vlgmr.msra.gmra.mxu1 %vm194_vm1, %v1410_v5  ;;  %1204 = vmatmul.msk.bf16.vlgmr.msra.gmra.mxu3 %vm194_vm1, %v1422_v13 }
 0x162   : > { %v585_v3 = vpop.f32.mrf.mxu3 }
 0x164   : > { %v652_v57 = vpop.f32.mrf.mxu2 }
 0x165   : > { %v637_v36 = vpop.f32.mrf.mxu1  ;;  %v612_v1 = vpop.f32.mrf.mxu0 }
 0x166   : > { %v641_v59 = vadd.f32 %v637_v36, %v614_v56 }
 0x168   : > { %v642_v39 = vmax.f32 %v1529_v10, %v641_v59 }
 0x16c   : > { %v654_v60 = vpop.f32.mrf.mxu2  ;;  %v665_v61 = vpop.f32.mrf.mxu3 }
 0x16d   : > { %v639_v62 = vpop.f32.mrf.mxu1  ;;  %v666_v17 = vadd.f32 %v665_v61, %v652_v57  ;;  %v691_v63 = vpop.f32.mrf.mxu0 }
 0x16f   : > { %v695_v2 = vadd.f32 %v691_v63, %v666_v17 }
 0x174   : > { %v667_v4 = vpop.f32.mrf.mxu3 }
 0x175   : > { %v718_v7 = vpop.f32.mrf.mxu1  ;;  %v693_v8 = vpop.f32.mrf.mxu0 }
 0x176   : > { %v722_v5 = vadd.f32 %v718_v7, %v695_v2 }
 0x17d   : > { %v720_v38 = vpop.f32.mrf.mxu1  ;;  %v1092_v47 = vpop.permute.xlu0 %1091 }
 0x182   : > { %v745_v9 = vpop.f32.mrf.mxu2 }
 0x183   : > { %v749_v13 = vadd.f32 %v745_v9, %v722_v5 }
 0x18a   : > { %v747_v11 = vpop.f32.mrf.mxu2  ;;  %v772_v12 = vpop.f32.mrf.mxu3 }
 0x18b   : > { %v776_v14 = vadd.f32 %v772_v12, %v749_v13 }
 0x18c   : > { %v799_v15 = vpop.f32.mrf.mxu0 }
 0x18d   : > { %v803_v16 = vadd.f32 %v799_v15, %v776_v14 }
 0x192   : > { %v774_v48 = vpop.f32.mrf.mxu3 }
 0x194   : > { %v826_v10 = vpop.f32.mrf.mxu1  ;;  %v801_v18 = vpop.f32.mrf.mxu0 }
 0x195   : > { %v830_v19 = vadd.f32 %v826_v10, %v803_v16 }
 0x19c   : > { %v828_v20 = vpop.f32.mrf.mxu1  ;;  %v894_v21 = vpop.f32.mrf.mxu0 }
 0x1a2   : > { %v853_v22 = vpop.f32.mrf.mxu2 }
 0x1a3   : > { %v857_v23 = vadd.f32 %v853_v22, %v830_v19 }
 0x1a4   : > { %v896_v42 = vpop.f32.mrf.mxu0 }
 0x1a5   : > { %v858_v24 = vmax.f32 %v642_v39, %v857_v23 }
 0x1aa   : > { %v881_v25 = vpop.f32.mrf.mxu3  ;;  %v855_v26 = vpop.f32.mrf.mxu2 }
 0x1ab   : > { %v895_v34 = vadd.f32 %v894_v21, %v881_v25 }
 0x1ac   : > { %v920_v27 = vpop.f32.mrf.mxu1 }
 0x1ad   : > { %v924_v0 = vadd.f32 %v920_v27, %v895_v34 }
 0x1b2   : > { %v883_v28 = vpop.f32.mrf.mxu3 }
 0x1b4   : > { %v922_v29 = vpop.f32.mrf.mxu1 }
 0x1ba   : > { %v947_v30 = vpop.f32.mrf.mxu2 }
 0x1bb   : > { %v951_v37 = vadd.f32 %v947_v30, %v924_v0 }
 0x1c2   : > { %v974_v31 = vpop.f32.mrf.mxu3  ;;  %v949_v55 = vpop.f32.mrf.mxu2 }
 0x1c3   : > { %v978_v51 = vadd.f32 %v974_v31, %v951_v37 }
 0x1c4   : > { %v1001_v32 = vpop.f32.mrf.mxu0 }
 0x1c5   : > { %v1005_v41 = vadd.f32 %v1001_v32, %v978_v51 }
 0x1ca   : > { %v976_v33 = vpop.f32.mrf.mxu3 }
 0x1cc   : > { %v1003_v35 = vpop.f32.mrf.mxu0 }
 0x1da   : > { %v1055_v40 = vpop.f32.mrf.mxu2 }
 0x1dc   : > { %v1028_v43 = vpop.f32.mrf.mxu1 }
 0x1dd   : > { %v1032_v44 = vadd.f32 %v1028_v43, %v1005_v41 }
 0x1df   : > { %v1059_v6 = vadd.f32 %v1055_v40, %v1032_v44 }
 0x1e2   : > { %v1082_v45 = vpop.f32.mrf.mxu3  ;;  %v1057_v58 = vpop.f32.mrf.mxu2 }
 0x1e3   : > { %v1086_v46 = vadd.f32 %v1082_v45, %v1059_v6 }
 0x1e4   : > { %v1030_v49 = vpop.f32.mrf.mxu1 }
 0x1e5   : > { %v1087_v50 = vmax.f32 %v858_v24, %v1086_v46 }
 0x1e7   : > { %v1094_v52 = vadd.f32 %v1092_v47, %v1087_v50 }
 0x1e9   : > { %v1095_v53 = vmax.f32 %v1094_v52, 0.0 }
 0x1ea   : > { %v1084_v54 = vpop.f32.mrf.mxu3 }
 0x1eb   : > { %1096 = vst [vmem:[%s168_s19] sm:$0xff] %v1095_v53 }
 0x1ec PF: > { %s13_s12 = sadd.s32 1, %s1227_s12  }
 0x1ed   : > { %p10_p4 = scmp.ge.s32.totalorder %s13_s12, 4  }
 0x1ef   :  { %12 = sbr.rel (!%p10_p4) target bundleno = 1 (0x1), region = 73 }

</bundles_post_ra>
